<compile_context>
chip_gen: v7x
topology: tpu7x:2x2x1
jax: 0.10.0
libtpu: 0.0.40
codegen_flags: <defaults>
</compile_context>

<pallas_src>
import functools

import numpy as np
import jax
import jax.numpy as jnp
from jax.experimental import pallas as pl
from jax.experimental.pallas import tpu as pltpu


def _contrast_loss_kernel(q_ref, t_ref, mpos_ref, mneg_ref,
                          loss_ref, valid_ref, *, inv_tao):
    eps = 1e-8
    tb, s2, _ = t_ref.shape

    q = q_ref[...].astype(jnp.float32)          # (TB, 1, H)
    t = t_ref[...].astype(jnp.float32)          # (TB, S2, H)

    # ---- fused double normalization ----------------------------------------
    # reference: rows are normalized once (no eps), then sim() re-normalizes
    # the (now unit) rows by (1 + 1e-8) and normalizes q by (||q|| + 1e-8):
    #   s = (q . t) * rsqrt(|t|^2) / (1 + 1e-8) / (||q|| + 1e-8)
    sq_t = jnp.sum(t * t, axis=-1)                       # (TB, S2)
    inv_t = jax.lax.rsqrt(sq_t)                          # EUP; no eps (matches reference;
                                                         # all-zero rows -> NaN like torch)
    s_raw = jnp.sum(t * q, axis=-1)                      # (TB, S2) VPU bcast-MAC (no M=1 MXU)
    q_norm = jnp.sqrt(jnp.sum(q * q, axis=-1))           # (TB, 1)
    scale = (1.0 / (1.0 + eps)) / (q_norm + eps)         # (TB, 1)

    e = jnp.exp(s_raw * inv_t * scale * inv_tao)         # (TB, S2)

    # ---- masked reductions (exactly reproduces torch.cat([pos, neg]) sums) --
    mpos = mpos_ref[...].astype(jnp.float32).reshape(tb, s2)   # {0,1}
    mneg = mneg_ref[...].astype(jnp.float32).reshape(tb, s2)

    e_pos = jnp.where(mpos > 0.0, e, 0.0)                # select, NaN-safe for unmasked rows
    e_neg = jnp.where(mneg > 0.0, e, 0.0)
    num = jnp.sum(e_pos, axis=-1, keepdims=True)         # (TB, 1)
    den = num + jnp.sum(e_neg, axis=-1, keepdims=True)   # (TB, 1)

    n_pos = jnp.sum(mpos, axis=-1, keepdims=True)
    n_neg = jnp.sum(mneg, axis=-1, keepdims=True)
    valid = jnp.logical_and(n_pos > 0.0, n_neg > 0.0)    # (TB, 1)

    loss = -jnp.log(num / (den + eps))                   # exact divide (scalar-ish per batch)
    loss_ref[...] = jnp.where(valid, loss, 0.0)[:, :, None]    # (TB, 1, 1)
    valid_ref[...] = jnp.where(valid, 1.0, 0.0)[:, :, None]    # (TB, 1, 1)


def _pick_batch_tile(batch, bytes_per_batch, budget_bytes):
    """Largest divisor of `batch` whose tmap block stays within the budget."""
    cap = max(1, budget_bytes // max(1, bytes_per_batch))
    cap = min(cap, batch)
    tb = 1
    for d in range(1, batch + 1):
        if batch % d == 0 and d <= cap:
            tb = d
    return tb


def contrast_loss(pos_query, tmap, mask2d_pos, mask2d_neg,
                  margin=1, tao=1.0, neg_ratio=20.0, batch_tile=None):
    """Pallas implementation of ContrastLoss.forward.

    pos_query : (B, H)        (any float dtype; kept as-is)
    tmap      : (B, S, S, H)  (any float dtype; kept as-is)
    mask2d_pos: (B, S, S) bool
    mask2d_neg: (B, S, S) bool
    returns   : (1,) float32  (mean over batches with non-empty pos & neg sets)
    """
    del margin, neg_ratio  # unused in the forward pass (as in the reference)
    B, S, S_, H = tmap.shape
    assert S == S_
    S2 = S * S

    # Keep the caller's dtype (no f32 upcast -> no extra HBM bytes); masks as int8.
    q = pos_query.reshape(B, 1, H)
    t = tmap.reshape(B, S2, H)
    mp = mask2d_pos.reshape(B, 1, S2).astype(jnp.int8)
    mn = mask2d_neg.reshape(B, 1, S2).astype(jnp.int8)

    # Batch tile: <= ~8 MiB per tmap buffer (x2 double-buffered = 16 MiB),
    # comfortably inside v7x's 64 MiB physical VMEM and the 32 MiB scoped limit.
    bytes_per_batch = S2 * H * jnp.dtype(tmap.dtype).itemsize
    tb = batch_tile if batch_tile is not None else _pick_batch_tile(
        B, bytes_per_batch, 8 * 1024 * 1024)
    assert B % tb == 0
    grid = (B // tb,)

    kernel = functools.partial(_contrast_loss_kernel, inv_tao=1.0 / float(tao))

    loss_b, valid_b = pl.pallas_call(
        kernel,
        out_shape=(jax.ShapeDtypeStruct((B, 1, 1), jnp.float32),
                   jax.ShapeDtypeStruct((B, 1, 1), jnp.float32)),
        grid_spec=pltpu.PrefetchScalarGridSpec(
            num_scalar_prefetch=0,
            grid=grid,
            in_specs=[
                pl.BlockSpec((tb, 1, H), lambda b: (b, 0, 0)),    # pos_query
                pl.BlockSpec((tb, S2, H), lambda b: (b, 0, 0)),   # tmap (flattened, native dtype)
                pl.BlockSpec((tb, 1, S2), lambda b: (b, 0, 0)),   # pos mask (int8)
                pl.BlockSpec((tb, 1, S2), lambda b: (b, 0, 0)),   # neg mask (int8)
            ],
            out_specs=[
                pl.BlockSpec((tb, 1, 1), lambda b: (b, 0, 0)),    # per-batch loss
                pl.BlockSpec((tb, 1, 1), lambda b: (b, 0, 0)),    # per-batch validity
            ],
        ),
        compiler_params=pltpu.CompilerParams(
            dimension_semantics=("parallel",),          # v7x: shard batch tiles over 2 TCs
            vmem_limit_bytes=32 * 1024 * 1024),         # raise v5e's 16 MiB default, safe on v7x
    )(q, t, mp, mn)

    # Glue: mean over valid batches (matches sum(loss)/len(loss)).
    loss_sum = jnp.sum(loss_b)
    count = jnp.sum(valid_b)
    # Defined behavior when no batch is valid: return 0 (the reference raises).
    return (loss_sum / jnp.maximum(count, 1.0)).reshape(1)


def _reference_contrast_loss(pos_query, tmap, mpos, mneg, tao=1.0):
    """Pure numpy port of the PyTorch forward (for verification)."""
    pos_query = np.asarray(pos_query, dtype=np.float32)
    tmap = np.asarray(tmap, dtype=np.float32)
    mpos = np.asarray(mpos)
    mneg = np.asarray(mneg)

    def sim(x, y):
        xn = x / (np.linalg.norm(x, axis=-1, keepdims=True) + 1e-8)
        yn = y / (np.linalg.norm(y, axis=-1, keepdims=True) + 1e-8)
        return xn @ yn.T

    losses = []
    for i in range(tmap.shape[0]):
        tmp1 = tmap[i][mpos[i], :]
        tmp2 = tmap[i][mneg[i], :]
        pos = tmp1 / np.linalg.norm(tmp1, axis=-1, keepdims=True)
        neg = tmp2 / np.linalg.norm(tmp2, axis=-1, keepdims=True)
        if pos.shape[0] == 0 or neg.shape[0] == 0:
            continue
        ps = sim(pos_query[i:i + 1], pos)
        ns = sim(pos_query[i:i + 1], neg)
        all_sim = np.concatenate([ps, ns], axis=-1)
        num = np.exp(ps / tao).sum(-1)
        den = np.exp(all_sim / tao).sum(-1)
        losses.append(-np.log(num / (den + 1e-8)))
    return sum(losses) / len(losses)


if __name__ == "__main__":
    B, S, H = 2, 8, 32

    key = jax.random.PRNGKey(0)
    k1, k2, k3, k4 = jax.random.split(key, 4)

    pos_query = jax.random.normal(k1, (B, H), dtype=jnp.float32)
    tmap = jax.random.normal(k2, (B, S, S, H), dtype=jnp.float32)

    mask2d_pos = jax.random.bernoulli(k3, 0.3, (B, S, S))
    # guarantee at least one positive per batch, and keep a slot free for a negative
    mask2d_pos = mask2d_pos.at[:, 0, 0].set(True)
    mask2d_pos = mask2d_pos.at[:, 0, 1].set(False)
    mask2d_neg = jax.random.bernoulli(k4, 0.4, (B, S, S)) & (~mask2d_pos)
    mask2d_neg = mask2d_neg.at[:, 0, 1].set(True)

    # f32 path: verify against the numpy port of the PyTorch reference.
    out = contrast_loss(pos_query, tmap, mask2d_pos, mask2d_neg,
                        margin=1, tao=1.0, neg_ratio=20.0)
    out = jax.block_until_ready(out)
    ref = _reference_contrast_loss(pos_query, tmap, mask2d_pos, mask2d_neg, tao=1.0)
    np.testing.assert_allclose(np.asarray(out), np.asarray(ref), rtol=5e-5, atol=5e-5)

    # bf16 path (no upcast in the wrapper): smoke test, loose tolerance.
    out_bf16 = contrast_loss(pos_query.astype(jnp.bfloat16),
                             tmap.astype(jnp.bfloat16),
                             mask2d_pos, mask2d_neg,
                             margin=1, tao=1.0, neg_ratio=20.0)
    out_bf16 = jax.block_until_ready(out_bf16)
    assert np.all(np.isfinite(np.asarray(out_bf16)))
    np.testing.assert_allclose(np.asarray(out_bf16), np.asarray(out),
                               rtol=1e-1, atol=5e-2)

    print("KERNEL_OK")
</pallas_src>

<mosaic_0001>
module attributes {stable_mosaic.version = 11 : i64} {
  func.func @_contrast_loss_kernel(%arg0: i32, %arg1: memref<2x1x32xf32, #tpu.memory_space<vmem>>, %arg2: memref<2x64x32xf32, #tpu.memory_space<vmem>>, %arg3: memref<2x1x64xi8, #tpu.memory_space<vmem>>, %arg4: memref<2x1x64xi8, #tpu.memory_space<vmem>>, %arg5: memref<2x1x1xf32, #tpu.memory_space<vmem>>, %arg6: memref<2x1x1xf32, #tpu.memory_space<vmem>>) attributes {dimension_semantics = [#tpu.dimension_semantics<parallel>], iteration_bounds = array<i64: 1>, scalar_prefetch = 0 : i64, scratch_operands = 0 : i64, tpu.core_type = #tpu.core_type<tc>, window_params = [{transform_indices = @transform_0, window_bounds = array<i64: 2, 1, 32>}, {transform_indices = @transform_1, window_bounds = array<i64: 2, 64, 32>}, {transform_indices = @transform_2, window_bounds = array<i64: 2, 1, 64>}, {transform_indices = @transform_3, window_bounds = array<i64: 2, 1, 64>}, {transform_indices = @transform_4, window_bounds = array<i64: 2, 1, 1>}, {transform_indices = @transform_5, window_bounds = array<i64: 2, 1, 1>}]} {
    %c0 = arith.constant 0 : index
    %c0_0 = arith.constant 0 : index
    %c0_1 = arith.constant 0 : index
    %0 = vector.load %arg1[%c0, %c0_0, %c0_1] : memref<2x1x32xf32, #tpu.memory_space<vmem>>, vector<2x1x32xf32>
    %c0_2 = arith.constant 0 : index
    %c0_3 = arith.constant 0 : index
    %c0_4 = arith.constant 0 : index
    %1 = vector.load %arg2[%c0_2, %c0_3, %c0_4] : memref<2x64x32xf32, #tpu.memory_space<vmem>>, vector<2x64x32xf32>
    %2 = arith.mulf %1, %1 : vector<2x64x32xf32>
    %cst = arith.constant dense<0.000000e+00> : vector<2x64xf32>
    %3 = vector.multi_reduction <add>, %2, %cst [2] : vector<2x64x32xf32> to vector<2x64xf32>
    %4 = math.rsqrt %3 : vector<2x64xf32>
    %5 = vector.broadcast %0 : vector<2x1x32xf32> to vector<2x64x32xf32>
    %6 = arith.mulf %1, %5 : vector<2x64x32xf32>
    %cst_5 = arith.constant dense<0.000000e+00> : vector<2x64xf32>
    %7 = vector.multi_reduction <add>, %6, %cst_5 [2] : vector<2x64x32xf32> to vector<2x64xf32>
    %8 = arith.mulf %0, %0 : vector<2x1x32xf32>
    %cst_6 = arith.constant dense<0.000000e+00> : vector<2x1xf32>
    %9 = vector.multi_reduction <add>, %8, %cst_6 [2] : vector<2x1x32xf32> to vector<2x1xf32>
    %10 = math.sqrt %9 : vector<2x1xf32>
    %cst_7 = arith.constant 9.99999993E-9 : f32
    %11 = vector.broadcast %cst_7 : f32 to vector<2x1xf32>
    %12 = arith.addf %10, %11 : vector<2x1xf32>
    %cst_8 = arith.constant 1.000000e+00 : f32
    %13 = vector.broadcast %cst_8 : f32 to vector<2x1xf32>
    %14 = arith.divf %13, %12 : vector<2x1xf32>
    %15 = arith.mulf %7, %4 : vector<2x64xf32>
    %16 = vector.broadcast %14 : vector<2x1xf32> to vector<2x64xf32>
    %17 = arith.mulf %15, %16 : vector<2x64xf32>
    %cst_9 = arith.constant 1.000000e+00 : f32
    %18 = vector.broadcast %cst_9 : f32 to vector<2x64xf32>
    %19 = arith.mulf %17, %18 : vector<2x64xf32>
    %20 = math.exp %19 : vector<2x64xf32>
    %c0_10 = arith.constant 0 : index
    %c0_11 = arith.constant 0 : index
    %c0_12 = arith.constant 0 : index
    %21 = vector.load %arg3[%c0_10, %c0_11, %c0_12] : memref<2x1x64xi8, #tpu.memory_space<vmem>>, vector<2x1x64xi8>
    %22 = arith.sitofp %21 : vector<2x1x64xi8> to vector<2x1x64xf32>
    %23 = vector.shape_cast %22 : vector<2x1x64xf32> to vector<2x64xf32>
    %c0_13 = arith.constant 0 : index
    %c0_14 = arith.constant 0 : index
    %c0_15 = arith.constant 0 : index
    %24 = vector.load %arg4[%c0_13, %c0_14, %c0_15] : memref<2x1x64xi8, #tpu.memory_space<vmem>>, vector<2x1x64xi8>
    %25 = arith.sitofp %24 : vector<2x1x64xi8> to vector<2x1x64xf32>
    %26 = vector.shape_cast %25 : vector<2x1x64xf32> to vector<2x64xf32>
    %cst_16 = arith.constant 0.000000e+00 : f32
    %27 = vector.broadcast %cst_16 : f32 to vector<2x64xf32>
    %28 = arith.cmpf ogt, %23, %27 : vector<2x64xf32>
    %cst_17 = arith.constant 0.000000e+00 : f32
    %29 = vector.broadcast %cst_17 : f32 to vector<2x64xf32>
    %30 = arith.select %28, %20, %29 : vector<2x64xi1>, vector<2x64xf32>
    %cst_18 = arith.constant 0.000000e+00 : f32
    %31 = vector.broadcast %cst_18 : f32 to vector<2x64xf32>
    %32 = arith.cmpf ogt, %26, %31 : vector<2x64xf32>
    %cst_19 = arith.constant 0.000000e+00 : f32
    %33 = vector.broadcast %cst_19 : f32 to vector<2x64xf32>
    %34 = arith.select %32, %20, %33 : vector<2x64xi1>, vector<2x64xf32>
    %cst_20 = arith.constant dense<0.000000e+00> : vector<2xf32>
    %35 = vector.multi_reduction <add>, %30, %cst_20 [1] : vector<2x64xf32> to vector<2xf32>
    %36 = vector.shape_cast %35 : vector<2xf32> to vector<2x1xf32>
    %cst_21 = arith.constant dense<0.000000e+00> : vector<2xf32>
    %37 = vector.multi_reduction <add>, %34, %cst_21 [1] : vector<2x64xf32> to vector<2xf32>
    %38 = vector.shape_cast %37 : vector<2xf32> to vector<2x1xf32>
    %39 = arith.addf %36, %38 : vector<2x1xf32>
    %cst_22 = arith.constant dense<0.000000e+00> : vector<2xf32>
    %40 = vector.multi_reduction <add>, %23, %cst_22 [1] : vector<2x64xf32> to vector<2xf32>
    %41 = vector.shape_cast %40 : vector<2xf32> to vector<2x1xf32>
    %cst_23 = arith.constant dense<0.000000e+00> : vector<2xf32>
    %42 = vector.multi_reduction <add>, %26, %cst_23 [1] : vector<2x64xf32> to vector<2xf32>
    %43 = vector.shape_cast %42 : vector<2xf32> to vector<2x1xf32>
    %cst_24 = arith.constant 0.000000e+00 : f32
    %44 = vector.broadcast %cst_24 : f32 to vector<2x1xf32>
    %45 = arith.cmpf ogt, %41, %44 : vector<2x1xf32>
    %cst_25 = arith.constant 0.000000e+00 : f32
    %46 = vector.broadcast %cst_25 : f32 to vector<2x1xf32>
    %47 = arith.cmpf ogt, %43, %46 : vector<2x1xf32>
    %48 = arith.andi %45, %47 : vector<2x1xi1>
    %cst_26 = arith.constant 9.99999993E-9 : f32
    %49 = vector.broadcast %cst_26 : f32 to vector<2x1xf32>
    %50 = arith.addf %39, %49 : vector<2x1xf32>
    %51 = arith.divf %36, %50 : vector<2x1xf32>
    %52 = math.log %51 : vector<2x1xf32>
    %cst_27 = arith.constant 0.000000e+00 : f32
    %53 = vector.broadcast %cst_27 : f32 to vector<2x1xf32>
    %54 = arith.subf %53, %52 : vector<2x1xf32>
    %cst_28 = arith.constant 0.000000e+00 : f32
    %55 = vector.broadcast %cst_28 : f32 to vector<2x1xf32>
    %56 = arith.select %48, %54, %55 : vector<2x1xi1>, vector<2x1xf32>
    %57 = vector.shape_cast %56 : vector<2x1xf32> to vector<2x1x1xf32>
    %c0_29 = arith.constant 0 : index
    %c0_30 = arith.constant 0 : index
    %c0_31 = arith.constant 0 : index
    %58 = vector.load %arg5[%c0_29, %c0_30, %c0_31] : memref<2x1x1xf32, #tpu.memory_space<vmem>>, vector<2x1x1xf32>
    tpu.vector_store %arg5[%c0_29, %c0_30, %c0_31], %57 {strides = array<i32>} : memref<2x1x1xf32, #tpu.memory_space<vmem>>, vector<2x1x1xf32>,
    %cst_32 = arith.constant 1.000000e+00 : f32
    %cst_33 = arith.constant 0.000000e+00 : f32
    %59 = vector.broadcast %cst_32 : f32 to vector<2x1xf32>
    %60 = vector.broadcast %cst_33 : f32 to vector<2x1xf32>
    %61 = arith.select %48, %59, %60 : vector<2x1xi1>, vector<2x1xf32>
    %62 = vector.shape_cast %61 : vector<2x1xf32> to vector<2x1x1xf32>
    %c0_34 = arith.constant 0 : index
    %c0_35 = arith.constant 0 : index
    %c0_36 = arith.constant 0 : index
    %63 = vector.load %arg6[%c0_34, %c0_35, %c0_36] : memref<2x1x1xf32, #tpu.memory_space<vmem>>, vector<2x1x1xf32>
    tpu.vector_store %arg6[%c0_34, %c0_35, %c0_36], %62 {strides = array<i32>} : memref<2x1x1xf32, #tpu.memory_space<vmem>>, vector<2x1x1xf32>,
    return
  }
  func.func @transform_0(%arg0: i32) -> (i32, i32, i32) {
    %c0_i32 = arith.constant 0 : i32
    %c0_i32_0 = arith.constant 0 : i32
    %c0_i32_1 = arith.constant 0 : i32
    return %arg0, %c0_i32, %c0_i32_0 : i32, i32, i32
  }
  func.func @transform_1(%arg0: i32) -> (i32, i32, i32) {
    %c0_i32 = arith.constant 0 : i32
    %c0_i32_0 = arith.constant 0 : i32
    %c0_i32_1 = arith.constant 0 : i32
    return %arg0, %c0_i32, %c0_i32_0 : i32, i32, i32
  }
  func.func @transform_2(%arg0: i32) -> (i32, i32, i32) {
    %c0_i32 = arith.constant 0 : i32
    %c0_i32_0 = arith.constant 0 : i32
    %c0_i32_1 = arith.constant 0 : i32
    return %arg0, %c0_i32, %c0_i32_0 : i32, i32, i32
  }
  func.func @transform_3(%arg0: i32) -> (i32, i32, i32) {
    %c0_i32 = arith.constant 0 : i32
    %c0_i32_0 = arith.constant 0 : i32
    %c0_i32_1 = arith.constant 0 : i32
    return %arg0, %c0_i32, %c0_i32_0 : i32, i32, i32
  }
  func.func @transform_4(%arg0: i32) -> (i32, i32, i32) {
    %c0_i32 = arith.constant 0 : i32
    %c0_i32_0 = arith.constant 0 : i32
    %c0_i32_1 = arith.constant 0 : i32
    return %arg0, %c0_i32, %c0_i32_0 : i32, i32, i32
  }
  func.func @transform_5(%arg0: i32) -> (i32, i32, i32) {
    %c0_i32 = arith.constant 0 : i32
    %c0_i32_0 = arith.constant 0 : i32
    %c0_i32_1 = arith.constant 0 : i32
    return %arg0, %c0_i32, %c0_i32_0 : i32, i32, i32
  }
}

</mosaic_0001>

<bundles_post_ra>
// kernel: tpu_custom_call.1
= control target key start
LH: loop header
LB: loop body
LE: loop exit
PB: predicated region body
PF: predicated region fallthrough
CT: control target
= control target key end

     0   :  { %vm53_vm0 = vcmask 261120   ;;  %vm196_vm1 = vcmask 253952   ;;  %v120_v30 = vlaneseq  ;;  %vm624_vm6 = vcmask 130112   ;;  %s1540_s1 = inlined_call_operand.vmem [shape: f32[2,64,32], index: 1, kind: input, shape index: {}]   ;;  %s1541_s0 = inlined_call_operand.vmem [shape: f32[2,1,32], index: 0, kind: input, shape index: {}]   ;;  %s1542_s2 = inlined_call_operand.vmem [shape: s8[2,1,64], index: 2, kind: input, shape index: {}]   ;;  %s1543_s3 = inlined_call_operand.vmem [shape: s8[2,1,64], index: 3, kind: input, shape index: {}]   ;;  %s1544_s5 = inlined_call_operand.vmem [shape: f32[2,1,1], index: 5, kind: output, shape index: {1}]   ;;  %s1545_s4 = inlined_call_operand.vmem [shape: f32[2,1,1], index: 4, kind: output, shape index: {0}]  }
   0x1   :  { %v1071_v0 = vld [vmem:[%s1540_s1] sm:$0xff]  ;;  %v1081_v2 = vld [vmem:[%s1540_s1 + $0x8] sm:$0xff]  ;;  %v1115_v16 = vld [vmem:[%s1540_s1 + $0x50] sm:$0xff]  ;;  %vm631_vm7 = vcmask 195712   ;;  %vm638_vm8 = vcmask 261312   ;;  %vm645_vm9 = vcmask 326912  }
   0x2   :  { %v1076_v1 = vld [vmem:[%s1541_s0] sm:$0x1]  ;;  %v37_v3 = vmul.f32 %v1071_v0, %v1071_v0  ;;  %v38_v5 = vmul.f32 %v1081_v2, %v1081_v2  ;;  %v1092_v6 = vld [vmem:[%s1541_s0 + $0x1] sm:$0x1]  ;;  %v1099_v8 = vld [vmem:[%s1540_s1 + $0x48] sm:$0xff]  ;;  %v47_v20 = vmul.f32 %v1115_v16, %v1115_v16  ;;  %v1167_v37 = vshrl.u32 %v120_v30, 7 }
   0x3   :  { %v194_v4 = vmul.f32 %v1076_v1, %v1076_v1  ;;  %v195_v7 = vmul.f32 %v1092_v6, %v1092_v6  ;;  %v1104_v9 = vld [vmem:[%s1540_s1 + $0x40] sm:$0xff]  ;;  %v46_v14 = vmul.f32 %v1099_v8, %v1099_v8  ;;  %v1120_v17 = vld [vmem:[%s1540_s1 + $0x10] sm:$0xff]  ;;  %v1131_v22 = vld [vmem:[%s1540_s1 + $0x58] sm:$0xff]  ;;  %vm652_vm10 = vcmask 392512  }
   0x4   :  { %v54_v10 = vsel %vm53_vm0, %v37_v3, 0.0  ;;  %v57_v12 = vsel %vm53_vm0, %v38_v5, 0.0  ;;  %v45_v15 = vmul.f32 %v1104_v9, %v1104_v9  ;;  %v39_v21 = vmul.f32 %v1120_v17, %v1120_v17  ;;  %v1136_v23 = vld [vmem:[%s1540_s1 + $0x18] sm:$0xff]  ;;  %v1147_v28 = vld [vmem:[%s1540_s1 + $0x60] sm:$0xff]  ;;  %v34_v35 = vld [vmem:[%s1540_s1 + $0x68] sm:$0xff] }
   0x5   :  { %v197_v11 = vsel %vm196_vm1, %v194_v4, 0.0  ;;  %55 = vadd.xlane.f32.xlu1 %v54_v10  ;;  %v200_v13 = vsel %vm196_vm1, %v195_v7, 0.0  ;;  %v81_v18 = vsel %vm53_vm0, %v46_v14, 0.0  ;;  %v84_v24 = vsel %vm53_vm0, %v47_v20, 0.0  ;;  %v1152_v29 = vld [vmem:[%s1540_s1 + $0x20] sm:$0xff]  ;;  %v26_v36 = vld [vmem:[%s1540_s1 + $0x28] sm:$0xff] }
   0x6   :  { %198 = vadd.xlane.f32.xlu0 %v197_v11  ;;  %v78_v19 = vsel %vm53_vm0, %v45_v15, 0.0  ;;  %v60_v25 = vsel %vm53_vm0, %v39_v21, 0.0  ;;  %v48_v26 = vmul.f32 %v1131_v22, %v1131_v22  ;;  %v40_v27 = vmul.f32 %v1136_v23, %v1136_v23  ;;  %v35_v42 = vld [vmem:[%s1540_s1 + $0x70] sm:$0xff]  ;;  %v36_v49 = vld [vmem:[%s1540_s1 + $0x78] sm:$0xff] }
   0x7   :  { %v49_v33 = vmul.f32 %v1147_v28, %v1147_v28  ;;  %v41_v34 = vmul.f32 %v1152_v29, %v1152_v29  ;;  %v50_v40 = vmul.f32 %v34_v35, %v34_v35  ;;  %v42_v41 = vmul.f32 %v26_v36, %v26_v36  ;;  %v27_v43 = vld [vmem:[%s1540_s1 + $0x30] sm:$0xff]  ;;  %v28_v50 = vld [vmem:[%s1540_s1 + $0x38] sm:$0xff] }
   0x8   :  { %v87_v31 = vsel %vm53_vm0, %v48_v26, 0.0  ;;  %v63_v32 = vsel %vm53_vm0, %v40_v27, 0.0  ;;  %v1178_v44 = vsub.s32 0, %v1167_v37  ;;  %v51_v47 = vmul.f32 %v35_v42, %v35_v42 }
   0x9   :  { %58 = vadd.xlane.f32.xlu1 %v57_v12  ;;  %v90_v38 = vsel %vm53_vm0, %v49_v33, 0.0  ;;  %v66_v39 = vsel %vm53_vm0, %v41_v34, 0.0  ;;  %v93_v45 = vsel %vm53_vm0, %v50_v40, 0.0  ;;  %v69_v46 = vsel %vm53_vm0, %v42_v41, 0.0 }
   0xa   :  { %201 = vadd.xlane.f32.xlu0 %v200_v13  ;;  %v43_v48 = vmul.f32 %v27_v43, %v27_v43  ;;  %v123_v51 = vrot.slane %v1076_v1, %v1178_v44  ;;  %v96_v52 = vsel %vm53_vm0, %v51_v47, 0.0  ;;  %v52_v54 = vmul.f32 %v36_v49, %v36_v49 }
   0xb   :  { %v44_v55 = vmul.f32 %v28_v50, %v28_v50  ;;  %v127_v56 = vrot.slane %v1092_v6, %v1178_v44  ;;  %v1034_v27 = vmov 0   ;;  %vm659_vm11 = vcmask 458112  }
   0xc   :  { %v72_v53 = vsel %vm53_vm0, %v43_v48, 0.0  ;;  %v99_v57 = vsel %vm53_vm0, %v52_v54, 0.0  ;;  %v131_v59 = vmul.f32 %v123_v51, %v1081_v2  ;;  %v130_v60 = vmul.f32 %v123_v51, %v1071_v0  ;;  %957 = vset.pattern.permute.xlu1 %v1034_v27  ;;  %956 = vset.pattern.permute.xlu0 %v1034_v27 }
   0xd   :  { %82 = vadd.xlane.f32.xlu1 %v81_v18  ;;  %v75_v58 = vsel %vm53_vm0, %v44_v55, 0.0  ;;  %v139_v63 = vmul.f32 %v127_v56, %v1099_v8  ;;  %v138_v1 = vmul.f32 %v127_v56, %v1104_v9  ;;  %v140_v2 = vmul.f32 %v127_v56, %v1115_v16 }
   0xe   :  { %79 = vadd.xlane.f32.xlu0 %v78_v19  ;;  %v149_v61 = vsel %vm53_vm0, %v131_v59, 0.0  ;;  %v146_v62 = vsel %vm53_vm0, %v130_v60, 0.0  ;;  %v132_v0 = vmul.f32 %v123_v51, %v1120_v17  ;;  %v141_v7 = vmul.f32 %v127_v56, %v1131_v22 }
   0xf   :  { %v173_v3 = vsel %vm53_vm0, %v139_v63, 0.0  ;;  %v170_v4 = vsel %vm53_vm0, %v138_v1, 0.0  ;;  %v176_v5 = vsel %vm53_vm0, %v140_v2, 0.0  ;;  %v133_v8 = vmul.f32 %v123_v51, %v1136_v23 }
  0x10   :  { %v152_v6 = vsel %vm53_vm0, %v132_v0, 0.0  ;;  %v179_v9 = vsel %vm53_vm0, %v141_v7, 0.0  ;;  %v142_v11 = vmul.f32 %v127_v56, %v1147_v28  ;;  %v134_v12 = vmul.f32 %v123_v51, %v1152_v29 }
  0x11   :  { %85 = vadd.xlane.f32.xlu1 %v84_v24  ;;  %v155_v10 = vsel %vm53_vm0, %v133_v8, 0.0  ;;  %v143_v15 = vmul.f32 %v127_v56, %v34_v35  ;;  %v135_v16 = vmul.f32 %v123_v51, %v26_v36  ;;  %v144_v19 = vmul.f32 %v127_v56, %v35_v42 }
  0x12   :  { %61 = vadd.xlane.f32.xlu0 %v60_v25  ;;  %v182_v13 = vsel %vm53_vm0, %v142_v11, 0.0  ;;  %v158_v14 = vsel %vm53_vm0, %v134_v12, 0.0  ;;  %v136_v20 = vmul.f32 %v123_v51, %v27_v43  ;;  %v145_v23 = vmul.f32 %v127_v56, %v36_v49 }
  0x13   :  { %v185_v17 = vsel %vm53_vm0, %v143_v15, 0.0  ;;  %v161_v18 = vsel %vm53_vm0, %v135_v16, 0.0  ;;  %v188_v21 = vsel %vm53_vm0, %v144_v19, 0.0  ;;  %v137_v24 = vmul.f32 %v123_v51, %v28_v50 }
  0x14   :  { %v164_v22 = vsel %vm53_vm0, %v136_v20, 0.0  ;;  %v191_v25 = vsel %vm53_vm0, %v145_v23, 0.0  ;;  %v1036_v19 = vmov 1985246804   ;;  %vm666_vm12 = vcmask 523712  }
  0x15   :  { %88 = vadd.xlane.f32.xlu1 %v87_v31  ;;  %v167_v26 = vsel %vm53_vm0, %v137_v24, 0.0  ;;  %v333_v20 = vunpack.c.l.s4 %v1036_v19  ;;  %vm853_vm0 = vcmask 1041409  }
  0x16   :  { %64 = vadd.xlane.f32.xlu0 %v63_v32 }
  0x19   :  { %91 = vadd.xlane.f32.xlu1 %v90_v38 }
  0x1a   :  { %67 = vadd.xlane.f32.xlu0 %v66_v39 }
  0x1d   :  { %94 = vadd.xlane.f32.xlu1 %v93_v45 }
  0x1e   :  { %70 = vadd.xlane.f32.xlu0 %v69_v46 }
  0x21   :  { %97 = vadd.xlane.f32.xlu1 %v96_v52 }
  0x22   :  { %73 = vadd.xlane.f32.xlu0 %v72_v53 }
  0x25   :  { %100 = vadd.xlane.f32.xlu1 %v99_v57 }
  0x26   :  { %76 = vadd.xlane.f32.xlu0 %v75_v58 }
  0x29   :  { %150 = vadd.xlane.f32.xlu1 %v149_v61 }
  0x2a   :  { %147 = vadd.xlane.f32.xlu0 %v146_v62 }
  0x2d   :  { %174 = vadd.xlane.f32.xlu1 %v173_v3 }
  0x2e   :  { %171 = vadd.xlane.f32.xlu0 %v170_v4 }
  0x31   :  { %177 = vadd.xlane.f32.xlu1 %v176_v5 }
  0x32   :  { %153 = vadd.xlane.f32.xlu0 %v152_v6 }
  0x35   :  { %180 = vadd.xlane.f32.xlu1 %v179_v9 }
  0x36   :  { %156 = vadd.xlane.f32.xlu0 %v155_v10 }
  0x39   :  { %183 = vadd.xlane.f32.xlu1 %v182_v13 }
  0x3a   :  { %159 = vadd.xlane.f32.xlu0 %v158_v14 }
  0x3d   :  { %186 = vadd.xlane.f32.xlu1 %v185_v17  ;;  %v1035_v17 = vmov 839922192  }
  0x3e   :  { %162 = vadd.xlane.f32.xlu0 %v161_v18  ;;  %v326_v18 = vunpack.c.l.s4 %v1035_v17 }
  0x41   :  { %189 = vadd.xlane.f32.xlu1 %v188_v21 }
  0x42   :  { %165 = vadd.xlane.f32.xlu0 %v164_v22 }
  0x45   :  { %192 = vadd.xlane.f32.xlu1 %v191_v25 }
  0x46   :  { %168 = vadd.xlane.f32.xlu0 %v167_v26 }
  0x92   :  { %v56_v28 = vpop.xlane.xlu1 %55 }
  0x93   :  { %v199_v29 = vpop.xlane.xlu0 %198 }
  0x94   :  { %958 = vrsqrt.f32 %v199_v29  ;;  %vm205_vm2 = vcmp.eq.f32.partialorder %v199_v29, inf  ;;  %v208_v41 = vand.u32 2147483648, %v199_v29  ;;  %vm207_vm3 = vcmp.eq.f32.partialorder %v199_v29, 0.0 }
  0x96   :  { %v59_v31 = vpop.xlane.xlu1 %58 }
  0x97   :  { %v202_v32 = vpop.xlane.xlu0 %201 }
  0x98   :  { %960 = vrsqrt.f32 %v202_v32  ;;  %vm212_vm4 = vcmp.eq.f32.partialorder %v202_v32, inf  ;;  %v215_v48 = vand.u32 2147483648, %v202_v32  ;;  %vm214_vm5 = vcmp.eq.f32.partialorder %v202_v32, 0.0 }
  0x9a   :  { %v83_v33 = vpop.xlane.xlu1 %82 }
  0x9b   :  { %v80_v34 = vpop.xlane.xlu0 %79 }
  0x9e   :  { %v959_v35 = vpop.eup %958  ;;  %v86_v36 = vpop.xlane.xlu1 %85 }
  0x9f   :  { %v1222_v38 = vpop.xlane.xlu0 %61  ;;  %v204_v39 = vmul.f32 %v959_v35, %v199_v29 }
  0xa1   :  { %v206_v40 = vsel %vm205_vm2, %v199_v29, %v204_v39  ;;  %v327_v29 = vunpack.c.0.s8 %v326_v18  ;;  %vm856_vm2 = vcmask 517120  }
  0xa2   :  { %v961_v42 = vpop.eup %960  ;;  %v89_v43 = vpop.xlane.xlu1 %88  ;;  %v209_v46 = vsel %vm207_vm3, %v208_v41, %v206_v40 }
  0xa3   :  { %v1224_v45 = vpop.xlane.xlu0 %64  ;;  %v211_v47 = vmul.f32 %v961_v42, %v202_v32  ;;  %v217_v50 = vadd.f32 1e-08, %v209_v46  ;;  %v1249_v40 = vsub.s32 %v327_v29, %v1167_v37 }
  0xa5   :  { %v213_v49 = vsel %vm212_vm4, %v202_v32, %v211_v47  ;;  %962 = vrcp.f32 %v217_v50 }
  0xa6   :  { %v216_v51 = vsel %vm214_vm5, %v215_v48, %v213_v49  ;;  %v92_v52 = vpop.xlane.xlu1 %91  ;;  %964 = vrsqrt.f32 %v56_v28 }
  0xa7   :  { %v1226_v53 = vpop.xlane.xlu0 %67  ;;  %v218_v54 = vadd.f32 1e-08, %v216_v51  ;;  %966 = vrsqrt.f32 %v59_v31  ;;  %v334_v31 = vunpack.c.0.s8 %v333_v20 }
  0xa9   :  { %968 = vrcp.f32 %v218_v54 }
  0xaa   :  { %v95_v55 = vpop.xlane.xlu1 %94  ;;  %970 = vrsqrt.f32 %v83_v33 }
  0xab   :  { %v1228_v56 = vpop.xlane.xlu0 %70  ;;  %972 = vrsqrt.f32 %v80_v34 }
  0xac   :  { %974 = vrsqrt.f32 %v86_v36 }
  0xad   :  { %976 = vrsqrt.f32 %v89_v43 }
  0xae   :  { %v1230_v57 = vpop.xlane.xlu1 %97  ;;  %978 = vrsqrt.f32 %v92_v52 }
  0xaf   :  { %v1232_v58 = vpop.xlane.xlu0 %73  ;;  %v963_v61 = vpop.eup %962 }
  0xb0   :  { %v965_v62 = vpop.eup %964  ;;  %v1237_v2 = vrot.slane %v963_v61, %v1178_v44 }
  0xb1   :  { %v967_v63 = vpop.eup %966 }
  0xb2   :  { %v1234_v59 = vpop.xlane.xlu1 %100 }
  0xb3   :  { %v77_v60 = vpop.xlane.xlu0 %76  ;;  %v969_v4 = vpop.eup %968 }
  0xb4   :  { %v971_v6 = vpop.eup %970  ;;  %v1242_v10 = vrot.slane %v969_v4, %v1178_v44 }
  0xb5   :  { %v973_v9 = vpop.eup %972 }
  0xb6   :  { %v151_v1 = vpop.xlane.xlu1 %150  ;;  %v975_v23 = vpop.eup %974 }
  0xb7   :  { %v148_v3 = vpop.xlane.xlu0 %147  ;;  %v224_v0 = vmul.f32 %v967_v63, %v151_v1  ;;  %v977_v33 = vpop.eup %976 }
  0xb8   :  { %v223_v5 = vmul.f32 %v965_v62, %v148_v3  ;;  %v979_v42 = vpop.eup %978 }
  0xb9   :  { %v248_v7 = vmul.f32 %v1237_v2, %v224_v0 }
  0xba   :  { %v247_v8 = vmul.f32 %v1237_v2, %v223_v5  ;;  %v175_v11 = vpop.xlane.xlu1 %174 }
  0xbb   :  { %v172_v12 = vpop.xlane.xlu0 %171  ;;  %v265_v13 = vmul.f32 1.442695, %v248_v7  ;;  %v232_v15 = vmul.f32 %v971_v6, %v175_v11 }
  0xbc   :  { %v263_v14 = vmul.f32 1.442695, %v247_v8  ;;  %v231_v16 = vmul.f32 %v973_v9, %v172_v12 }
  0xbd   :  { %980 = vpow2.f32 %v265_v13  ;;  %v256_v21 = vmul.f32 %v1242_v10, %v232_v15 }
  0xbe   :  { %v255_v22 = vmul.f32 %v1242_v10, %v231_v16  ;;  %982 = vpow2.f32 %v263_v14  ;;  %v178_v24 = vpop.xlane.xlu1 %177 }
  0xbf   :  { %v154_v25 = vpop.xlane.xlu0 %153  ;;  %984 = vrsqrt.f32 %v1222_v38  ;;  %v281_v26 = vmul.f32 1.442695, %v256_v21  ;;  %v233_v28 = vmul.f32 %v975_v23, %v178_v24  ;;  %v1252_v38 = vsub.s32 %v334_v31, %v1167_v37 }
  0xc0   :  { %v279_v27 = vmul.f32 1.442695, %v255_v22  ;;  %986 = vrsqrt.f32 %v95_v55 }
  0xc1   :  { %988 = vpow2.f32 %v281_v26  ;;  %v257_v32 = vmul.f32 %v1242_v10, %v233_v28 }
  0xc2   :  { %990 = vpow2.f32 %v279_v27  ;;  %v181_v34 = vpop.xlane.xlu1 %180 }
  0xc3   :  { %v157_v35 = vpop.xlane.xlu0 %156  ;;  %v283_v36 = vmul.f32 1.442695, %v257_v32  ;;  %v234_v39 = vmul.f32 %v977_v33, %v181_v34 }
  0xc5   :  { %992 = vpow2.f32 %v283_v36  ;;  %v258_v41 = vmul.f32 %v1242_v10, %v234_v39 }
  0xc6   :  { %v184_v43 = vpop.xlane.xlu1 %183  ;;  %994 = vrsqrt.f32 %v1224_v45 }
  0xc7   :  { %v1255_v46 = vpop.xlane.xlu0 %159  ;;  %v981_v47 = vpop.eup %980  ;;  %v285_v48 = vmul.f32 1.442695, %v258_v41  ;;  %v235_v49 = vmul.f32 %v979_v42, %v184_v43  ;;  %996 = vrsqrt.f32 %v77_v60 }
  0xc8   :  { %v983_v50 = vpop.eup %982  ;;  %v345_v51 = vrot.slane %v981_v47, %v1249_v40  ;;  %v352_v52 = vrot.slane %v981_v47, %v1252_v38 }
  0xc9   :  { %v985_v54 = vpop.eup %984  ;;  %998 = vpow2.f32 %v285_v48  ;;  %v259_v55 = vmul.f32 %v1242_v10, %v235_v49  ;;  %v331_v61 = vrot.slane %v983_v50, %v1249_v40  ;;  %v338_v3 = vrot.slane %v983_v50, %v1252_v38 }
  0xca   :  { %v987_v62 = vpop.eup %986  ;;  %1000 = vrsqrt.f32 %v1230_v57  ;;  %v187_v63 = vpop.xlane.xlu1 %186  ;;  %v550_v45 = vcombine.low %v345_v51, %v352_v52  ;;  %v225_v4 = vmul.f32 %v985_v54, %v154_v25 }
  0xcb   :  { %v1263_v1 = vpop.xlane.xlu0 %162  ;;  %v989_v60 = vpop.eup %988  ;;  %v549_v5 = vcombine.low %v331_v61, %v338_v3  ;;  %v287_v6 = vmul.f32 1.442695, %v259_v55  ;;  %v236_v7 = vmul.f32 %v987_v62, %v187_v63  ;;  %1002 = vrsqrt.f32 %v1226_v53 }
  0xcc   :  { %v991_v0 = vpop.eup %990  ;;  %569 = vperm.xlu1 %957, %v550_v45   ;;  %v249_v12 = vmul.f32 %v1237_v2, %v225_v4  ;;  %v457_v13 = vrot.slane %v989_v60, %v1249_v40  ;;  %v464_v17 = vrot.slane %v989_v60, %v1252_v38 }
  0xcd   :  { %v443_v8 = vrot.slane %v991_v0, %v1249_v40  ;;  %566 = vperm.xlu0 %956, %v549_v5   ;;  %v450_v57 = vrot.slane %v991_v0, %v1252_v38  ;;  %1004 = vpow2.f32 %v287_v6  ;;  %v260_v19 = vmul.f32 %v1242_v10, %v236_v7 }
  0xce   :  { %1006 = vrsqrt.f32 %v1234_v59  ;;  %v190_v21 = vpop.xlane.xlu1 %189  ;;  %v267_v24 = vmul.f32 1.442695, %v249_v12  ;;  %v558_v28 = vcombine.low %v457_v13, %v464_v17 }
  0xcf   :  { %v1267_v9 = vpop.xlane.xlu0 %165  ;;  %v993_v11 = vpop.eup %992  ;;  %v557_v14 = vcombine.low %v443_v8, %v450_v57  ;;  %v289_v29 = vmul.f32 1.442695, %v260_v19 }
  0xd0   :  { %v471_v15 = vrot.slane %v993_v11, %v1249_v40  ;;  %v478_v16 = vrot.slane %v993_v11, %v1252_v38  ;;  %v995_v18 = vpop.eup %994  ;;  %1008 = vpow2.f32 %v267_v24 }
  0xd1   :  { %v997_v20 = vpop.eup %996  ;;  %590 = vperm.xlu1 %957, %v557_v14   ;;  %v226_v25 = vmul.f32 %v995_v18, %v157_v35  ;;  %1010 = vrsqrt.f32 %v1228_v56 }
  0xd2   :  { %v559_v22 = vcombine.low %v471_v15, %v478_v16  ;;  %1012 = vpow2.f32 %v289_v29  ;;  %v193_v41 = vpop.xlane.xlu1 %192 }
  0xd3   :  { %v169_v53 = vpop.xlane.xlu0 %168  ;;  %v999_v23 = vpop.eup %998  ;;  %v250_v34 = vmul.f32 %v1237_v2, %v226_v25 }
  0xd4   :  { %v230_v26 = vmul.f32 %v997_v20, %v169_v53  ;;  %v1001_v27 = vpop.eup %1000  ;;  %596 = vperm.xlu0 %956, %v559_v22   ;;  %v485_v33 = vrot.slane %v999_v23, %v1249_v40  ;;  %v492_v59 = vrot.slane %v999_v23, %v1252_v38 }
  0xd5   :  { %v237_v31 = vmul.f32 %v1001_v27, %v190_v21  ;;  %593 = vperm.xlu1 %957, %v558_v28   ;;  %v1003_v35 = vpop.eup %1002  ;;  %v269_v47 = vmul.f32 1.442695, %v250_v34 }
  0xd6   :  { %v254_v32 = vmul.f32 %v1237_v2, %v230_v26  ;;  %v560_v42 = vcombine.low %v485_v33, %v492_v59  ;;  %v227_v48 = vmul.f32 %v1003_v35, %v1255_v46 }
  0xd7   :  { %v261_v39 = vmul.f32 %v1242_v10, %v237_v31  ;;  %v1005_v43 = vpop.eup %1004 }
  0xd8   :  { %v277_v36 = vmul.f32 1.442695, %v254_v32  ;;  %744 = vperm.xlu0 %956, %v559_v22   ;;  %v1007_v49 = vpop.eup %1006  ;;  %v499_v56 = vrot.slane %v1005_v43, %v1249_v40  ;;  %v506_v52 = vrot.slane %v1005_v43, %v1252_v38  ;;  %v251_v54 = vmul.f32 %v1237_v2, %v227_v48 }
  0xd9   :  { %714 = vperm.xlu1 %957, %v549_v5   ;;  %v291_v50 = vmul.f32 1.442695, %v261_v39  ;;  %v238_v51 = vmul.f32 %v1007_v49, %v193_v41 }
  0xda   :  { %1014 = vpow2.f32 %v277_v36  ;;  %v1009_v55 = vpop.eup %1008  ;;  %v561_v62 = vcombine.low %v499_v56, %v506_v52  ;;  %v271_v3 = vmul.f32 1.442695, %v251_v54 }
  0xdb   :  { %1016 = vpow2.f32 %v269_v47  ;;  %v262_v61 = vmul.f32 %v1242_v10, %v238_v51  ;;  %v1011_v46 = vpop.eup %1010  ;;  %v359_v4 = vrot.slane %v1009_v55, %v1249_v40  ;;  %v366_v0 = vrot.slane %v1009_v55, %v1252_v38 }
  0xdc   :  { %599 = vperm.xlu0 %956, %v560_v42   ;;  %1018 = vrsqrt.f32 %v1232_v58  ;;  %v1013_v63 = vpop.eup %1012 }
  0xdd   :  { %717 = vperm.xlu1 %957, %v550_v45   ;;  %1020 = vpow2.f32 %v291_v50  ;;  %v228_v45 = vmul.f32 %v1011_v46, %v1263_v1  ;;  %v293_v5 = vmul.f32 1.442695, %v262_v61  ;;  %v513_v10 = vrot.slane %v1013_v63, %v1249_v40 }
  0xde   :  { %v520_v7 = vrot.slane %v1013_v63, %v1252_v38  ;;  %1022 = vpow2.f32 %v271_v3  ;;  %v551_v57 = vcombine.low %v359_v4, %v366_v0 }
  0xdf   :  { %v252_v8 = vmul.f32 %v1237_v2, %v228_v45  ;;  %1024 = vpow2.f32 %v293_v5 }
  0xe0   :  { %747 = vperm.xlu0 %956, %v560_v42   ;;  %v562_v13 = vcombine.low %v513_v10, %v520_v7 }
  0xe1   :  { %738 = vperm.xlu1 %957, %v557_v14   ;;  %v273_v15 = vmul.f32 1.442695, %v252_v8  ;;  %v296_v8 = vld [vmem:[%s1542_s2 + $0x1] sm:$0x1] }
  0xe3   :  { %1026 = vpow2.f32 %v273_v15 }
  0xe4   :  { %v1015_v60 = vpop.eup %1014  ;;  %602 = vperm.xlu0 %956, %v561_v62  }
  0xe5   :  { %v429_v58 = vrot.slane %v1015_v60, %v1249_v40  ;;  %v436_v6 = vrot.slane %v1015_v60, %v1252_v38  ;;  %741 = vperm.xlu1 %957, %v558_v28   ;;  %v1017_v11 = vpop.eup %1016  ;;  %v614_v60 = vand.u32 127, %v120_v30 }
  0xe6   :  { %v1019_v12 = vpop.eup %1018  ;;  %v373_v17 = vrot.slane %v1017_v11, %v1249_v40  ;;  %v380_v18 = vrot.slane %v1017_v11, %v1252_v38 }
  0xe7   :  { %v556_v1 = vcombine.low %v429_v58, %v436_v6  ;;  %v1021_v14 = vpop.eup %1020  ;;  %v229_v16 = vmul.f32 %v1019_v12, %v1267_v9  ;;  %v619_v5 = vadd.s32 4294967288, %v614_v60  ;;  %v626_v58 = vadd.s32 4294967280, %v614_v60 }
  0xe8   :  { %750 = vperm.xlu0 %956, %v561_v62   ;;  %v527_v19 = vrot.slane %v1021_v14, %v1249_v40  ;;  %v534_v20 = vrot.slane %v1021_v14, %v1252_v38  ;;  %v552_v53 = vcombine.low %v373_v17, %v380_v18  ;;  %v1023_v22 = vpop.eup %1022  ;;  %v633_v10 = vadd.s32 4294967272, %v614_v60  ;;  %v302_v18 = vld [vmem:[%s1543_s3 + $0x1] sm:$0x1] }
  0xe9   :  { %572 = vperm.xlu1 %957, %v551_v57   ;;  %v253_v21 = vmul.f32 %v1237_v2, %v229_v16  ;;  %v1025_v24 = vpop.eup %1024  ;;  %v387_v25 = vrot.slane %v1023_v22, %v1249_v40  ;;  %v394_v26 = vrot.slane %v1023_v22, %v1252_v38  ;;  %v640_v7 = vadd.s32 4294967264, %v614_v60 }
  0xea   :  { %v563_v23 = vcombine.low %v527_v19, %v534_v20  ;;  %v541_v27 = vrot.slane %v1025_v24, %v1249_v40  ;;  %v548_v28 = vrot.slane %v1025_v24, %v1252_v38  ;;  %v622_v30 = vsub.s32 %v619_v5, %v1167_v37 }
  0xeb   :  { %v275_v9 = vmul.f32 1.442695, %v253_v21  ;;  %v553_v2 = vcombine.low %v387_v25, %v394_v26  ;;  %v617_v11 = vsub.s32 %v614_v60, %v1167_v37  ;;  %v654_v12 = vadd.s32 4294967248, %v614_v60 }
  0xec   :  { %605 = vperm.xlu0 %956, %v562_v13   ;;  %v564_v31 = vcombine.low %v541_v27, %v548_v28  ;;  %v1369_v14 = vsub.s32 %v626_v58, %v1167_v37  ;;  %v298_v16 = vunpack.c.0.s8 %v296_v8  ;;  %v1379_v20 = vsub.s32 %v633_v10, %v1167_v37 }
  0xed   :  { %720 = vperm.xlu1 %957, %v551_v57   ;;  %1028 = vpow2.f32 %v275_v9  ;;  %v1027_v29 = vpop.eup %1026  ;;  %v647_v57 = vadd.s32 4294967256, %v614_v60  ;;  %v1382_v21 = vsub.s32 %v640_v7, %v1167_v37  ;;  %v1389_v25 = vsub.s32 %v654_v12, %v1167_v37 }
  0xee   :  { %v401_v32 = vrot.slane %v1027_v29, %v1249_v40  ;;  %v408_v33 = vrot.slane %v1027_v29, %v1252_v38  ;;  %v304_v26 = vunpack.c.0.s8 %v302_v18  ;;  %v1392_v28 = vcvt.s32.f32 %v298_v16 }
  0xef   :  { %v1386_v22 = vsub.s32 %v647_v57, %v1167_v37 }
  0xf0   :  { %753 = vperm.xlu0 %956, %v562_v13   ;;  %v554_v59 = vcombine.low %v401_v32, %v408_v33  ;;  %v301_v13 = vld [vmem:[%s1543_s3] sm:$0x1]  ;;  %vm308_vm13 = vcmp.gt.f32.partialorder %v1392_v28, 0.0 }
  0xf1   :  { %575 = vperm.xlu1 %957, %v552_v53   ;;  %v303_v24 = vunpack.c.0.s8 %v301_v13 }
  0xf4   :  { %608 = vperm.xlu0 %956, %v563_v23  }
  0xf5   :  { %723 = vperm.xlu1 %957, %v552_v53  }
  0xf7   :  { %v1029_v34 = vpop.eup %1028 }
  0xf8   :  { %756 = vperm.xlu0 %956, %v563_v23   ;;  %v415_v36 = vrot.slane %v1029_v34, %v1249_v40  ;;  %v422_v35 = vrot.slane %v1029_v34, %v1252_v38  ;;  %v661_v23 = vadd.s32 4294967240, %v614_v60 }
  0xf9   :  { %578 = vperm.xlu1 %957, %v553_v2  }
  0xfa   :  { %v555_v39 = vcombine.low %v415_v36, %v422_v35  ;;  %v1407_v35 = vsub.s32 %v661_v23, %v1167_v37 }
  0xfc   :  { %611 = vperm.xlu0 %956, %v564_v31  }
  0xfd   :  { %726 = vperm.xlu1 %957, %v553_v2  }
 0x100   :  { %759 = vperm.xlu0 %956, %v564_v31  }
 0x101   :  { %581 = vperm.xlu1 %957, %v554_v59  }
 0x105   :  { %729 = vperm.xlu1 %957, %v554_v59  }
 0x109   :  { %584 = vperm.xlu1 %957, %v555_v39  }
 0x10d   :  { %732 = vperm.xlu1 %957, %v555_v39  }
 0x111   :  { %587 = vperm.xlu1 %957, %v556_v1  }
 0x115   :  { %735 = vperm.xlu1 %957, %v556_v1   ;;  %v295_v1 = vld [vmem:[%s1542_s2] sm:$0x1] }
 0x116   :  { %v297_v19 = vunpack.c.0.s8 %v295_v1 }
 0x118   :  { %v1396_v29 = vcvt.s32.f32 %v297_v19 }
 0x11a   :  { %vm307_vm14 = vcmp.gt.f32.partialorder %v1396_v29, 0.0 }
 0x14b   :  { %v1312_v41 = vpop.permute.xlu1 %569 }
 0x14c   :  { %v1314_v42 = vpop.permute.xlu0 %566  ;;  %v623_v31 = vrot.slane %v1312_v41, %v622_v30 }
 0x14d   :  { %v618_v32 = vrot.slane %v1314_v42, %v617_v11 }
 0x14f   :  { %v625_v60 = vsel %vm624_vm6, %v623_v31, %v618_v32 }
 0x150   :  { %v1316_v43 = vpop.permute.xlu1 %590 }
 0x151   :  { %v671_v27 = vrot.slane %v1316_v43, %v617_v11  ;;  %v1409_v43 = vcvt.s32.f32 %v303_v24 }
 0x153   :  { %v1318_v47 = vpop.permute.xlu0 %596  ;;  %vm711_vm1 = vcmp.gt.f32.partialorder %v1409_v43, 0.0 }
 0x154   :  { %v1320_v48 = vpop.permute.xlu1 %593  ;;  %v680_v33 = vrot.slane %v1318_v47, %v1369_v14 }
 0x155   :  { %v675_v53 = vrot.slane %v1320_v48, %v622_v30  ;;  %v1413_v48 = vcvt.s32.f32 %v304_v26 }
 0x157   :  { %v1322_v49 = vpop.permute.xlu0 %744  ;;  %v676_v34 = vsel %vm624_vm6, %v675_v53, %v671_v27  ;;  %vm712_vm15 = vcmp.gt.f32.partialorder %v1413_v48, 0.0 }
 0x158   :  { %v1324_v40 = vpop.permute.xlu1 %714  ;;  %v812_v47 = vrot.slane %v1322_v49, %v1369_v14 }
 0x159   :  { %v764_v5 = vrot.slane %v1324_v40, %v617_v11 }
 0x15b   :  { %v1326_v38 = vpop.permute.xlu0 %599 }
 0x15c   :  { %v1328_v50 = vpop.permute.xlu1 %717  ;;  %v685_v36 = vrot.slane %v1326_v38, %v1379_v20 }
 0x15d   :  { %v768_v41 = vrot.slane %v1328_v50, %v622_v30  ;;  %v681_v50 = vsel %vm631_vm7, %v680_v33, %v676_v34 }
 0x15e   :  { %v686_v49 = vsel %vm638_vm8, %v685_v36, %v681_v50 }
 0x15f   :  { %v1330_v51 = vpop.permute.xlu0 %747  ;;  %v769_v8 = vsel %vm624_vm6, %v768_v41, %v764_v5 }
 0x160   :  { %v1332_v56 = vpop.permute.xlu1 %738  ;;  %v817_v40 = vrot.slane %v1330_v51, %v1379_v20 }
 0x161   :  { %v803_v59 = vrot.slane %v1332_v56, %v617_v11 }
 0x163   :  { %v1334_v52 = vpop.permute.xlu0 %602 }
 0x164   :  { %v742_v54 = vpop.permute.xlu1 %741  ;;  %v690_v56 = vrot.slane %v1334_v52, %v1382_v21 }
 0x165   :  { %v807_v9 = vrot.slane %v742_v54, %v622_v30  ;;  %v896_v54 = vrot.slane %v1409_v43, %v1178_v44 }
 0x166   :  { %v691_v57 = vsel %vm645_vm9, %v690_v56, %v686_v49 }
 0x167   :  { %v1338_v61 = vpop.permute.xlu0 %750  ;;  %v808_v42 = vsel %vm624_vm6, %v807_v9, %v803_v59  ;;  %vm927_vm6 = vcmask 0  }
 0x168   :  { %v1336_v55 = vpop.permute.xlu1 %572  ;;  %v813_v52 = vsel %vm631_vm7, %v812_v47, %v808_v42 }
 0x169   :  { %v630_v10 = vrot.slane %v1336_v55, %v1369_v14  ;;  %v822_v55 = vrot.slane %v1338_v61, %v1382_v21 }
 0x16b   :  { %v1342_v62 = vpop.permute.xlu0 %605  ;;  %v632_v61 = vsel %vm631_vm7, %v630_v10, %v625_v60  ;;  %v881_v60 = vrot.slane %v1396_v29, %v1178_v44 }
 0x16c   :  { %v1340_v46 = vpop.permute.xlu1 %720  ;;  %v695_v58 = vrot.slane %v1342_v62, %v1386_v22 }
 0x16e   :  { %v696_v12 = vsel %vm652_vm10, %v695_v58, %v691_v57  ;;  %v885_v58 = vrot.slane %v1392_v28, %v1178_v44 }
 0x16f   :  { %v1346_v3 = vpop.permute.xlu0 %753 }
 0x170   :  { %v1344_v63 = vpop.permute.xlu1 %575  ;;  %v827_v13 = vrot.slane %v1346_v3, %v1386_v22 }
 0x171   :  { %v637_v62 = vrot.slane %v1344_v63, %v1379_v20  ;;  %v818_v63 = vsel %vm638_vm8, %v817_v40, %v813_v52 }
 0x173   :  { %v1353_v0 = vpop.permute.xlu0 %608  ;;  %v639_v18 = vsel %vm638_vm8, %v637_v62, %v632_v61 }
 0x174   :  { %v1348_v45 = vpop.permute.xlu1 %723  ;;  %v700_v7 = vrot.slane %v1353_v0, %v1389_v25  ;;  %v773_v0 = vrot.slane %v1340_v46, %v1369_v14 }
 0x175   :  { %v778_v19 = vrot.slane %v1348_v45, %v1379_v20 }
 0x176   :  { %v701_v46 = vsel %vm659_vm11, %v700_v7, %v696_v12  ;;  %v774_v23 = vsel %vm631_vm7, %v773_v0, %v769_v8  ;;  %v886_v8 = vsel %vm853_vm0, %v885_v58, %v881_v60 }
 0x177   :  { %v1371_v15 = vpop.permute.xlu0 %756  ;;  %v888_v28 = vsel %vm856_vm2, %v886_v8, 0.0 }
 0x178   :  { %v1351_v4 = vpop.permute.xlu1 %578 }
 0x179   :  { %v644_v30 = vrot.slane %v1351_v4, %v1382_v21  ;;  %v832_v4 = vrot.slane %v1371_v15, %v1389_v25 }
 0x17b   :  { %v612_v39 = vpop.permute.xlu0 %611  ;;  %v646_v24 = vsel %vm645_vm9, %v644_v30, %v639_v18 }
 0x17c   :  { %v1355_v6 = vpop.permute.xlu1 %726  ;;  %v705_v1 = vrot.slane %v612_v39, %v1407_v35 }
 0x17d   :  { %v783_v15 = vrot.slane %v1355_v6, %v1382_v21  ;;  %v779_v6 = vsel %vm638_vm8, %v778_v19, %v774_v23 }
 0x17e   :  { %v706_v53 = vsel %vm666_vm12, %v705_v1, %v701_v46 }
 0x17f   :  { %v760_v11 = vpop.permute.xlu0 %759  ;;  %v710_v32 = vsel %vm308_vm13, %v706_v53, 0.0 }
 0x180   :  { %v1373_v17 = vpop.permute.xlu1 %581  ;;  %v837_v3 = vrot.slane %v760_v11, %v1407_v35  ;;  %v852_v47 = vrot.slane %v710_v32, %v1178_v44  ;;  %v1037_v11 = vmov 0.0  }
 0x181   :  { %v651_v16 = vrot.slane %v1373_v17, %v1386_v22  ;;  %v823_v17 = vsel %vm645_vm9, %v822_v55, %v818_v63  ;;  %v923_v55 = vsub.s32 1, %v1167_v37 }
 0x182   :  { %v828_v26 = vsel %vm652_vm10, %v827_v13, %v823_v17 }
 0x183   :  { %v653_v27 = vsel %vm652_vm10, %v651_v16, %v646_v24  ;;  %v833_v31 = vsel %vm659_vm11, %v832_v4, %v828_v26 }
 0x184   :  { %v1394_v2 = vpop.permute.xlu1 %729  ;;  %v838_v21 = vsel %vm666_vm12, %v837_v3, %v833_v31 }
 0x185   :  { %v788_v45 = vrot.slane %v1394_v2, %v1386_v22  ;;  %v900_v22 = vrot.slane %v1413_v48, %v1178_v44  ;;  %v784_v2 = vsel %vm645_vm9, %v783_v15, %v779_v6  ;;  %v842_v56 = vsel %vm712_vm15, %v838_v21, 0.0 }
 0x186   :  { %v869_v29 = vrot.slane %v842_v56, %v1178_v44 }
 0x188   :  { %v585_v38 = vpop.permute.xlu1 %584 }
 0x189   :  { %v658_v14 = vrot.slane %v585_v38, %v1389_v25 }
 0x18b   :  { %v660_v33 = vsel %vm659_vm11, %v658_v14, %v653_v27 }
 0x18c   :  { %v733_v51 = vpop.permute.xlu1 %732 }
 0x18d   :  { %v793_v59 = vrot.slane %v733_v51, %v1389_v25  ;;  %v789_v25 = vsel %vm652_vm10, %v788_v45, %v784_v2 }
 0x18f   :  { %v794_v38 = vsel %vm659_vm11, %v793_v59, %v789_v25 }
 0x190   :  { %v588_v9 = vpop.permute.xlu1 %587 }
 0x191   :  { %v665_v20 = vrot.slane %v588_v9, %v1407_v35 }
 0x193   :  { %v667_v34 = vsel %vm666_vm12, %v665_v20, %v660_v33 }
 0x194   :  { %v709_v36 = vsel %vm307_vm14, %v667_v34, 0.0  ;;  %v736_v39 = vpop.permute.xlu1 %735 }
 0x195   :  { %v798_v41 = vrot.slane %v736_v39, %v1407_v35  ;;  %v848_v42 = vrot.slane %v709_v36, %v1178_v44  ;;  %v901_v35 = vsel %vm853_vm0, %v900_v22, %v896_v54 }
 0x196   :  { %v903_v10 = vsel %vm856_vm2, %v901_v35, 0.0 }
 0x197   :  { %v799_v50 = vsel %vm666_vm12, %v798_v41, %v794_v38  ;;  %v854_v5 = vsel %vm853_vm0, %v852_v47, %v848_v42 }
 0x198   :  { %v841_v49 = vsel %vm711_vm1, %v799_v50, 0.0  ;;  %v857_v48 = vsel %vm856_vm2, %v854_v5, 0.0 }
 0x199   :  { %858 = vadd.xlane.f32.xlu1 %v857_v48  ;;  %v865_v52 = vrot.slane %v841_v49, %v1178_v44 }
 0x19b   :  { %v870_v7 = vsel %vm853_vm0, %v869_v29, %v865_v52 }
 0x19c   :  { %v872_v43 = vsel %vm856_vm2, %v870_v7, 0.0 }
 0x19d   :  { %873 = vadd.xlane.f32.xlu0 %v872_v43  ;;  %904 = vadd.xlane.f32.xlu1 %v903_v10 }
 0x1a1   :  { %889 = vadd.xlane.f32.xlu0 %v888_v28 }
 0x226   :  { %v859_v54 = vpop.xlane.xlu1 %858 }
 0x22a   :  { %v874_v40 = vpop.xlane.xlu0 %873  ;;  %v905_v62 = vpop.xlane.xlu1 %904 }
 0x22b   :  { %v875_v1 = vadd.f32 %v874_v40, %v859_v54  ;;  %vm907_vm3 = vcmp.gt.f32.partialorder %v905_v62, 0.0 }
 0x22d   :  { %v909_v57 = vadd.f32 1e-08, %v875_v1 }
 0x22e   :  { %v890_v0 = vpop.xlane.xlu0 %889 }
 0x22f   :  { %1030 = vrcp.f32 %v909_v57  ;;  %vm906_vm4 = vcmp.gt.f32.partialorder %v890_v0, 0.0 }
 0x230   :  { %vm1514_vm5 = vmand %vm906_vm4, %vm907_vm3 }
 0x231   :  { %v930_v51 = vsel %vm1514_vm5, 1.0, %v1037_v11 }
 0x232   :  { %v935_v63 = vrot.slane %v930_v51, %v1178_v44  ;;  %v939_v12 = vrot.slane %v930_v51, %v923_v55 }
 0x234   :  { %942 = vst.msk [vmem:[%s1544_s5] sm:$0x1] %vm927_vm6, %v935_v63  ;;  %943 = vst.msk [vmem:[%s1544_s5 + $0x1] sm:$0x1] %vm927_vm6, %v939_v12 }
 0x239   :  { %v1031_v37 = vpop.eup %1030 }
 0x23a   :  { %v911_v13 = vmul.f32 %v1031_v37, %v859_v54 }
 0x23c   :  { %1032 = vlog2.f32 %v911_v13 }
 0x246   :  { %v1033_v16 = vpop.eup %1032 }
 0x247   :  { %v913_v61 = vmul.f32 0.6931472, %v1033_v16 }
 0x249   :  { %v914_v46 = vsub.f32 0.0, %v913_v61 }
 0x24b   :  { %v915_v4 = vsel %vm1514_vm5, %v914_v46, 0.0 }
 0x24c   :  { %v920_v14 = vrot.slane %v915_v4, %v1178_v44  ;;  %v924_v18 = vrot.slane %v915_v4, %v923_v55 }
 0x24e   :  { %928 = vst.msk [vmem:[%s1545_s4] sm:$0x1] %vm927_vm6, %v920_v14  ;;  %929 = vst.msk [vmem:[%s1545_s4 + $0x1] sm:$0x1] %vm927_vm6, %v924_v18 }

</bundles_post_ra>
